<compile_context>
chip_gen: v5e
topology: v5e:2x2
jax: 0.10.0
libtpu: 0.0.40
codegen_flags: <defaults>
</compile_context>

<pallas_src>
import functools

import jax
import jax.numpy as jnp
from jax.experimental import pallas as pl
from jax.experimental.pallas import tpu as pltpu

H1 = 128            # first hidden width  (nn.Linear(input_dim, 128))
H2 = 64             # second hidden width (nn.Linear(128, 64))
OUTW = 8            # padded width of the final layer (column 0 is the real output)
MAX_TILE_B = 4096   # keeps double-buffered tiles well inside v7x's scoped VMEM


def _round_up(x, m):
    return ((x + m - 1) // m) * m


def reward_mlp_kernel(x_ref, w1_ref, b1_ref, w2_ref, b2_ref, w3_ref, b3_ref, o_ref):
    # Layer 1: (tile_b, d_in) @ (d_in, 128), f32 accumulation, bias, ReLU.
    x = x_ref[...].astype(jnp.bfloat16)
    h1 = jnp.dot(x, w1_ref[...], preferred_element_type=jnp.float32) + b1_ref[...]
    h1 = jnp.maximum(h1, 0.0).astype(jnp.bfloat16)
    # Layer 2: (tile_b, 128) @ (128, 64).
    h2 = jnp.dot(h1, w2_ref[...], preferred_element_type=jnp.float32) + b2_ref[...]
    h2 = jnp.maximum(h2, 0.0).astype(jnp.bfloat16)
    # Layer 3: (tile_b, 64) @ (64, 8); only column 0 of w3/b3 carries real data.
    out = jnp.dot(h2, w3_ref[...], preferred_element_type=jnp.float32) + b3_ref[...]
    o_ref[...] = out.astype(o_ref.dtype)


def pack_params(params, input_dim):
    """Layout-only repack: bf16 weights, f32 biases, final layer padded 1 -> OUTW cols."""
    w1, b1, w2, b2, w3, b3 = params
    w1p = jnp.asarray(w1, jnp.float32).reshape(input_dim, H1).astype(jnp.bfloat16)
    b1p = jnp.asarray(b1, jnp.float32).reshape(1, H1)
    w2p = jnp.asarray(w2, jnp.float32).reshape(H1, H2).astype(jnp.bfloat16)
    b2p = jnp.asarray(b2, jnp.float32).reshape(1, H2)
    w3p = (jnp.zeros((H2, OUTW), jnp.float32)
           .at[:, 0].set(jnp.asarray(w3, jnp.float32).reshape(H2))
           .astype(jnp.bfloat16))
    b3p = jnp.zeros((1, OUTW), jnp.float32).at[0, 0].set(
        jnp.asarray(b3, jnp.float32).reshape(()))
    return (w1p, b1p, w2p, b2p, w3p, b3p)


def _choose_tile_b(batch, d_in):
    if batch <= 256:
        return _round_up(batch, 8)                     # single small tile
    # >= 2 tiles so both v7x TensorCores get work; multiple of 256 for the MXU.
    tile_b = min(MAX_TILE_B, _round_up(pl.cdiv(batch, 2), 256))
    # Keep double-buffered x tiles modest even for very wide inputs (v7x VMEM).
    while tile_b > 256 and 2 * tile_b * d_in * 4 > (8 << 20):
        tile_b //= 2
    return tile_b


@jax.jit
def reward_network_forward(x, packed_params):
    """Fused MLP forward. x: (B, input_dim) float32. Returns (B, 1) float32."""
    w1p, b1p, w2p, b2p, w3p, b3p = packed_params
    B, d_in = x.shape

    tile_b = _choose_tile_b(B, d_in)
    num_tiles = pl.cdiv(B, tile_b)
    b_pad = num_tiles * tile_b      # output sized so every out block is in-bounds

    f32, bf16 = 4, 2
    weight_bytes = (d_in * H1 + H1 * H2 + H2 * OUTW) * bf16 + (H1 + H2 + OUTW) * f32
    x_buf = 2 * tile_b * d_in * f32                 # double-buffered input tiles
    out_buf = 2 * tile_b * 128 * f32                # out blocks lane-pad 8 -> 128
    act_buf = tile_b * (H1 + H2) * (f32 + bf16)     # h1/h2 f32 accum + bf16 copies
    vmem_limit = min(int(1.5 * (weight_bytes + x_buf + out_buf + act_buf)) + (2 << 20),
                     64 << 20)

    cost = pl.CostEstimate(
        flops=2 * B * (d_in * H1 + H1 * H2 + H2 * OUTW),
        transcendentals=0,
        bytes_accessed=B * d_in * f32 + b_pad * OUTW * f32 + weight_bytes,
    )

    out = pl.pallas_call(
        reward_mlp_kernel,
        out_shape=jax.ShapeDtypeStruct((b_pad, OUTW), jnp.float32),
        grid=(num_tiles,),
        in_specs=[
            pl.BlockSpec((tile_b, d_in), lambda i: (i, 0)),   # x tile (pipelined)
            pl.BlockSpec((d_in, H1), lambda i: (0, 0)),       # w1 (VMEM-resident)
            pl.BlockSpec((1, H1), lambda i: (0, 0)),          # b1
            pl.BlockSpec((H1, H2), lambda i: (0, 0)),         # w2
            pl.BlockSpec((1, H2), lambda i: (0, 0)),          # b2
            pl.BlockSpec((H2, OUTW), lambda i: (0, 0)),       # w3 (column 0 real)
            pl.BlockSpec((1, OUTW), lambda i: (0, 0)),        # b3 (column 0 real)
        ],
        out_specs=pl.BlockSpec((tile_b, OUTW), lambda i: (i, 0)),
        compiler_params=pltpu.CompilerParams(
            dimension_semantics=("parallel",),
            vmem_limit_bytes=int(vmem_limit),
        ),
        cost_estimate=cost,
    )(x, w1p, b1p, w2p, b2p, w3p, b3p)

    # Tail/padded rows (garbage from the OOB tail tile) and padded columns are dropped.
    return out[:B, :1]


def init_params(key, input_dim):
    """Deterministic init mimicking PyTorch's default U(-1/sqrt(fan_in), 1/sqrt(fan_in))."""
    dims = [(input_dim, 128), (128, 64), (64, 1)]
    params = []
    for (fan_in, fan_out) in dims:
        key, kw, kb = jax.random.split(key, 3)
        bound = 1.0 / jnp.sqrt(jnp.float32(fan_in))
        w = jax.random.uniform(kw, (fan_in, fan_out), jnp.float32, -bound, bound)
        b = jax.random.uniform(kb, (1, fan_out), jnp.float32, -bound, bound)
        params.extend([w, b])
    return tuple(params)


def reference_forward(x, params):
    w1, b1, w2, b2, w3, b3 = params
    h1 = jnp.maximum(x @ w1 + b1, 0.0)
    h2 = jnp.maximum(h1 @ w2 + b2, 0.0)
    return h2 @ w3 + b3


if __name__ == "__main__":
    key = jax.random.PRNGKey(0)
    kx, kp = jax.random.split(key)

    input_dim = 32
    params = init_params(kp, input_dim)
    packed = pack_params(params, input_dim)

    # Small shapes covering: tiny single tile, non-256-aligned single tile,
    # and a two-tile grid with a non-divisible (OOB-read) tail tile.
    for batch in (8, 200, 1300):
        kx, kb = jax.random.split(kx)
        x = jax.random.normal(kb, (batch, input_dim), dtype=jnp.float32)

        out = jax.block_until_ready(reward_network_forward(x, packed))
        ref = reference_forward(x, params)

        assert out.shape == (batch, 1), out.shape
        # bf16 matmul operands with f32 accumulation vs the pure-f32 reference.
        assert jnp.allclose(out, ref, atol=2.5e-2, rtol=2.5e-2), (
            batch, float(jnp.max(jnp.abs(out - ref))))

    print("KERNEL_OK")
</pallas_src>

<mosaic_0001>
module attributes {stable_mosaic.version = 11 : i64} {
  func.func @reward_mlp_kernel(%arg0: i32, %arg1: memref<8x32xf32, #tpu.memory_space<vmem>>, %arg2: memref<32x128xbf16, #tpu.memory_space<vmem>>, %arg3: memref<1x128xf32, #tpu.memory_space<vmem>>, %arg4: memref<128x64xbf16, #tpu.memory_space<vmem>>, %arg5: memref<1x64xf32, #tpu.memory_space<vmem>>, %arg6: memref<64x8xbf16, #tpu.memory_space<vmem>>, %arg7: memref<1x8xf32, #tpu.memory_space<vmem>>, %arg8: memref<8x8xf32, #tpu.memory_space<vmem>>) attributes {dimension_semantics = [#tpu.dimension_semantics<parallel>], iteration_bounds = array<i64: 1>, scalar_prefetch = 0 : i64, scratch_operands = 0 : i64, tpu.core_type = #tpu.core_type<tc>, window_params = [{transform_indices = @transform_0, window_bounds = array<i64: 8, 32>}, {pipeline_mode = #tpu.pipeline_mode<synchronous>, transform_indices = @transform_1, window_bounds = array<i64: 32, 128>}, {pipeline_mode = #tpu.pipeline_mode<synchronous>, transform_indices = @transform_2, window_bounds = array<i64: 1, 128>}, {pipeline_mode = #tpu.pipeline_mode<synchronous>, transform_indices = @transform_3, window_bounds = array<i64: 128, 64>}, {pipeline_mode = #tpu.pipeline_mode<synchronous>, transform_indices = @transform_4, window_bounds = array<i64: 1, 64>}, {pipeline_mode = #tpu.pipeline_mode<synchronous>, transform_indices = @transform_5, window_bounds = array<i64: 64, 8>}, {pipeline_mode = #tpu.pipeline_mode<synchronous>, transform_indices = @transform_6, window_bounds = array<i64: 1, 8>}, {transform_indices = @transform_7, window_bounds = array<i64: 8, 8>}]} {
    %c0 = arith.constant 0 : index
    %c0_0 = arith.constant 0 : index
    %0 = vector.load %arg1[%c0, %c0_0] : memref<8x32xf32, #tpu.memory_space<vmem>>, vector<8x32xf32>
    %1 = arith.truncf %0 : vector<8x32xf32> to vector<8x32xbf16>
    %c0_1 = arith.constant 0 : index
    %c0_2 = arith.constant 0 : index
    %2 = vector.load %arg2[%c0_1, %c0_2] : memref<32x128xbf16, #tpu.memory_space<vmem>>, vector<32x128xbf16>
    %cst = arith.constant dense<0.000000e+00> : vector<8x128xf32>
    %3 = tpu.matmul %1, %2, %cst {dimension_numbers = #tpu.dot_dimension_numbers<[1], [0], [0], [1], [0, 0, 1, 1], [], []>} : vector<8x32xbf16>, vector<32x128xbf16>, vector<8x128xf32> -> vector<8x128xf32>
    %c0_3 = arith.constant 0 : index
    %c0_4 = arith.constant 0 : index
    %4 = vector.load %arg3[%c0_3, %c0_4] : memref<1x128xf32, #tpu.memory_space<vmem>>, vector<1x128xf32>
    %5 = vector.broadcast %4 : vector<1x128xf32> to vector<8x128xf32>
    %6 = arith.addf %3, %5 : vector<8x128xf32>
    %cst_5 = arith.constant 0.000000e+00 : f32
    %7 = vector.broadcast %cst_5 : f32 to vector<8x128xf32>
    %8 = arith.maximumf %6, %7 : vector<8x128xf32>
    %9 = arith.truncf %8 : vector<8x128xf32> to vector<8x128xbf16>
    %c0_6 = arith.constant 0 : index
    %c0_7 = arith.constant 0 : index
    %10 = vector.load %arg4[%c0_6, %c0_7] : memref<128x64xbf16, #tpu.memory_space<vmem>>, vector<128x64xbf16>
    %cst_8 = arith.constant dense<0.000000e+00> : vector<8x64xf32>
    %11 = tpu.matmul %9, %10, %cst_8 {dimension_numbers = #tpu.dot_dimension_numbers<[1], [0], [0], [1], [0, 0, 1, 1], [], []>} : vector<8x128xbf16>, vector<128x64xbf16>, vector<8x64xf32> -> vector<8x64xf32>
    %c0_9 = arith.constant 0 : index
    %c0_10 = arith.constant 0 : index
    %12 = vector.load %arg5[%c0_9, %c0_10] : memref<1x64xf32, #tpu.memory_space<vmem>>, vector<1x64xf32>
    %13 = vector.broadcast %12 : vector<1x64xf32> to vector<8x64xf32>
    %14 = arith.addf %11, %13 : vector<8x64xf32>
    %cst_11 = arith.constant 0.000000e+00 : f32
    %15 = vector.broadcast %cst_11 : f32 to vector<8x64xf32>
    %16 = arith.maximumf %14, %15 : vector<8x64xf32>
    %17 = arith.truncf %16 : vector<8x64xf32> to vector<8x64xbf16>
    %c0_12 = arith.constant 0 : index
    %c0_13 = arith.constant 0 : index
    %18 = vector.load %arg6[%c0_12, %c0_13] : memref<64x8xbf16, #tpu.memory_space<vmem>>, vector<64x8xbf16>
    %cst_14 = arith.constant dense<0.000000e+00> : vector<8x8xf32>
    %19 = tpu.matmul %17, %18, %cst_14 {dimension_numbers = #tpu.dot_dimension_numbers<[1], [0], [0], [1], [0, 0, 1, 1], [], []>} : vector<8x64xbf16>, vector<64x8xbf16>, vector<8x8xf32> -> vector<8x8xf32>
    %c0_15 = arith.constant 0 : index
    %c0_16 = arith.constant 0 : index
    %20 = vector.load %arg7[%c0_15, %c0_16] : memref<1x8xf32, #tpu.memory_space<vmem>>, vector<1x8xf32>
    %21 = vector.broadcast %20 : vector<1x8xf32> to vector<8x8xf32>
    %22 = arith.addf %19, %21 : vector<8x8xf32>
    %c0_17 = arith.constant 0 : index
    %c0_18 = arith.constant 0 : index
    %23 = vector.load %arg8[%c0_17, %c0_18] : memref<8x8xf32, #tpu.memory_space<vmem>>, vector<8x8xf32>
    tpu.vector_store %arg8[%c0_17, %c0_18], %22 {strides = array<i32>} : memref<8x8xf32, #tpu.memory_space<vmem>>, vector<8x8xf32>,
    return
  }
  func.func @transform_0(%arg0: i32) -> (i32, i32) {
    %c0_i32 = arith.constant 0 : i32
    %c0_i32_0 = arith.constant 0 : i32
    return %arg0, %c0_i32 : i32, i32
  }
  func.func @transform_1(%arg0: i32) -> (i32, i32) {
    %c0_i32 = arith.constant 0 : i32
    %c0_i32_0 = arith.constant 0 : i32
    %c0_i32_1 = arith.constant 0 : i32
    return %c0_i32, %c0_i32_0 : i32, i32
  }
  func.func @transform_2(%arg0: i32) -> (i32, i32) {
    %c0_i32 = arith.constant 0 : i32
    %c0_i32_0 = arith.constant 0 : i32
    %c0_i32_1 = arith.constant 0 : i32
    return %c0_i32, %c0_i32_0 : i32, i32
  }
  func.func @transform_3(%arg0: i32) -> (i32, i32) {
    %c0_i32 = arith.constant 0 : i32
    %c0_i32_0 = arith.constant 0 : i32
    %c0_i32_1 = arith.constant 0 : i32
    return %c0_i32, %c0_i32_0 : i32, i32
  }
  func.func @transform_4(%arg0: i32) -> (i32, i32) {
    %c0_i32 = arith.constant 0 : i32
    %c0_i32_0 = arith.constant 0 : i32
    %c0_i32_1 = arith.constant 0 : i32
    return %c0_i32, %c0_i32_0 : i32, i32
  }
  func.func @transform_5(%arg0: i32) -> (i32, i32) {
    %c0_i32 = arith.constant 0 : i32
    %c0_i32_0 = arith.constant 0 : i32
    %c0_i32_1 = arith.constant 0 : i32
    return %c0_i32, %c0_i32_0 : i32, i32
  }
  func.func @transform_6(%arg0: i32) -> (i32, i32) {
    %c0_i32 = arith.constant 0 : i32
    %c0_i32_0 = arith.constant 0 : i32
    %c0_i32_1 = arith.constant 0 : i32
    return %c0_i32, %c0_i32_0 : i32, i32
  }
  func.func @transform_7(%arg0: i32) -> (i32, i32) {
    %c0_i32 = arith.constant 0 : i32
    %c0_i32_0 = arith.constant 0 : i32
    return %arg0, %c0_i32 : i32, i32
  }
}

</mosaic_0001>

<bundles_post_ra>
// kernel: reward_network_forward.1
= control target key start
LH: loop header
LB: loop body
LE: loop exit
PB: predicated region body
PF: predicated region fallthrough
CT: control target
= control target key end

     0   :  { %vm49_vm0 = vcmask 261120   ;;  %vm187_vm1 = vcmask 523264   ;;  %vm204_vm2 = vcmask 64512   ;;  %s382_s1 = inlined_call_operand.vmem [shape: bf16[32,128], index: 1, kind: input, shape index: {}]   ;;  %s383_s0 = inlined_call_operand.vmem [shape: f32[8,32], index: 0, kind: input, shape index: {}]   ;;  %s384_s3 = inlined_call_operand.vmem [shape: bf16[128,64], index: 3, kind: input, shape index: {}]   ;;  %s385_s2 = inlined_call_operand.vmem [shape: f32[1,128], index: 2, kind: input, shape index: {}]   ;;  %s386_s4 = inlined_call_operand.vmem [shape: f32[1,64], index: 4, kind: input, shape index: {}]   ;;  %s387_s5 = inlined_call_operand.vmem [shape: bf16[64,8], index: 5, kind: input, shape index: {}]   ;;  %s388_s6 = inlined_call_operand.vmem [shape: f32[1,8], index: 6, kind: input, shape index: {}]   ;;  %s389_s7 = inlined_call_operand.vmem [shape: f32[8,8], index: 7, kind: output, shape index: {}]  }
   0x1   :  { %v269_v0 = vld [vmem:[%s382_s1 + $0x8] sm:$0xff]  ;;  %v277_v1 = vld [vmem:[%s384_s3 + $0x38] sm:$0xff]  ;;  %v268_v2 = vld [vmem:[%s382_s1] sm:$0xff] }
   0x2   :  { %59 = vmatpush.bf16.msra.mxu0 %v269_v0  ;;  %v27_v3 = vld [vmem:[%s383_s0] sm:$0xff]  ;;  %136 = vmatpush.bf16.msra.mxu1 %v277_v1  ;;  %v276_v4 = vld [vmem:[%s384_s3 + $0x30] sm:$0xff]  ;;  %v275_v6 = vld [vmem:[%s384_s3 + $0x28] sm:$0xff] }
   0x3   :  { %v28_v5 = vpack.c.bf16 %v27_v3, %v27_v3  ;;  %v274_v7 = vld [vmem:[%s384_s3 + $0x20] sm:$0xff]  ;;  %v273_v8 = vld [vmem:[%s384_s3 + $0x18] sm:$0xff]  ;;  %v272_v9 = vld [vmem:[%s384_s3 + $0x10] sm:$0xff] }
   0x4   :  { %v271_v10 = vld [vmem:[%s384_s3 + $0x8] sm:$0xff]  ;;  %v270_v11 = vld [vmem:[%s384_s3] sm:$0xff]  ;;  %v281_v12 = vld [vmem:[%s387_s5 + $0x18] sm:$0xff] }
   0x5   :  { %195 = vmatpush.bf16.msra.mxu2 %v281_v12  ;;  %v280_v13 = vld [vmem:[%s387_s5 + $0x10] sm:$0xff]  ;;  %v282_v14 = vld [vmem:[%s385_s2] ss:$0 sm:$0xff]  ;;  %v279_v20 = vld [vmem:[%s387_s5 + $0x8] sm:$0xff] }
   0x6   :  { %60 = vmatpush.bf16.msra.mxu0 %v268_v2  ;;  %137 = vmatpush.bf16.msra.mxu1 %v276_v4  ;;  %v278_v21 = vld [vmem:[%s387_s5] sm:$0xff] }
   0x7   :  { %v283_v22 = vld [vmem:[%s386_s4] ss:$0 sm:$0xff] }
   0x8   :  { %v284_v28 = vld [vmem:[%s388_s6] ss:$0 sm:$0xff] }
   0x9   :  { %218 = vmatmul.msk.bf16.vlgmr.msra.gmra.mxu0 %vm49_vm0, %v28_v5  ;;  %196 = vmatpush.bf16.msra.mxu2 %v280_v13 }
   0xa   :  { %138 = vmatpush.bf16.msra.mxu1 %v275_v6 }
   0xd   :  { %197 = vmatpush.bf16.msra.mxu2 %v279_v20 }
   0xe   :  { %139 = vmatpush.bf16.msra.mxu1 %v274_v7 }
  0x11   :  { %198 = vmatpush.bf16.msra.mxu2 %v278_v21 }
  0x12   :  { %140 = vmatpush.bf16.msra.mxu1 %v273_v8 }
  0x16   :  { %141 = vmatpush.bf16.msra.mxu1 %v272_v9 }
  0x1a   :  { %142 = vmatpush.bf16.msra.mxu1 %v271_v10 }
  0x1e   :  { %143 = vmatpush.bf16.msra.mxu1 %v270_v11 }
  0x86   :  { %v62_v15 = vpop.f32.mrf.mxu0 }
  0x87   :  { %v63_v16 = vadd.f32 %v282_v14, %v62_v15 }
  0x89   :  { %v66_v17 = vmax.f32 %v63_v16, 0.0 }
  0x8b   :  { %v67_v18 = vpack.c.bf16 %v66_v17, %v66_v17 }
  0x8d   :  { %144 = vmatmul.bf16.vlgmr.msra.gmra.mxu1 %v67_v18 }
  0x8e   :  { %v64_v19 = vpop.f32.mrf.mxu0 }
 0x10a   :  { %v145_v23 = vpop.f32.mrf.mxu1 }
 0x10b   :  { %v146_v24 = vadd.f32 %v283_v22, %v145_v23 }
 0x10d   :  { %v149_v25 = vmax.f32 %v146_v24, 0.0 }
 0x10f   :  { %v150_v26 = vpack.c.bf16 %v149_v25, %v149_v25 }
 0x111   :  { %267 = vmatmul.msk.bf16.vlgmr.msra.gmra.mxu2 %vm187_vm1, %v150_v26 }
 0x112   :  { %v147_v27 = vpop.f32.mrf.mxu1 }
 0x194   :  { %v200_v29 = vpop.f32.mrf.mxu2 }
 0x195   :  { %v201_v30 = vadd.f32 %v284_v28, %v200_v29 }
 0x197   :  { %205 = vst.msk [vmem:[%s389_s7] sm:$0xff] %vm204_vm2, %v201_v30 }
 0x19c   :  { %v202_v31 = vpop.f32.mrf.mxu2 }

</bundles_post_ra>
